<compile_context>
chip_gen: v7x
topology: tpu7x:2x2x1
jax: 0.10.0
libtpu: 0.0.40
codegen_flags: <defaults>
</compile_context>

<pallas_src>
import functools

import numpy as np
import jax
import jax.numpy as jnp
from jax import lax
from jax.experimental import pallas as pl
from jax.experimental.pallas import tpu as pltpu


# ------------------------------ fused kernel -------------------------------

def _layernorm_c(x, w, b, eps):
    # LayerNorm over the channel (sublane) axis, per spatial column.
    mu = jnp.mean(x, axis=0, keepdims=True)
    xc = x - mu
    var = jnp.mean(xc * xc, axis=0, keepdims=True)
    return w * (xc * lax.rsqrt(var + eps)) + b


def _nafblock_kernel(H, W, eps,
                     inp_ref, mask_ref,
                     n1w_ref, n1b_ref,
                     w1_ref, b1_ref, wdw_ref, bdw_ref,
                     wsca_ref, bsca_ref, w3_ref, b3_ref, beta_ref,
                     n2w_ref, n2b_ref, w4_ref, b4_ref, w5_ref, b5_ref,
                     gamma_ref,
                     out_ref):
    HW = H * W
    inp = inp_ref[...]                                   # (C, HW) f32

    # ---- spatial branch ----
    x = _layernorm_c(inp, n1w_ref[...], n1b_ref[...], eps)

    # conv1: 1x1, C -> DW (lane-dense MXU matmul)
    x = jnp.dot(w1_ref[...], x, preferred_element_type=jnp.float32) + b1_ref[...]

    # conv2: depthwise 3x3, stride 1, pad 1, via lane rolls + border masks.
    wdw = wdw_ref[...]                                   # (DW, 9) per-channel taps
    masks = mask_ref[...]                                # (9, HW) zero-pad masks
    acc = jnp.zeros_like(x)
    k = 0
    for di in (-1, 0, 1):
        for dj in (-1, 0, 1):
            off = di * W + dj
            shifted = x if off == 0 else pltpu.roll(x, (-off) % HW, 1)
            acc = acc + shifted * masks[k:k + 1, :] * wdw[:, k:k + 1]
            k += 1
    x = acc + bdw_ref[...]

    # SimpleGate
    dw = x.shape[0]
    g = x[:dw // 2, :] * x[dw // 2:, :]                  # (C, HW)

    # SCA: global-average-pool + 1x1 conv channel scale.
    # mean_HW(Wsca @ g) == Wsca @ mean_HW(g)  (linearity) -> stays lane-dense.
    s = jnp.mean(jnp.dot(wsca_ref[...], g, preferred_element_type=jnp.float32),
                 axis=1, keepdims=True) + bsca_ref[...]  # (C, 1)
    g = g * s

    # conv3: 1x1, C -> C   (dropout1 is identity: rate 0.0)
    x = jnp.dot(w3_ref[...], g, preferred_element_type=jnp.float32) + b3_ref[...]
    y = inp + x * beta_ref[...]

    # ---- FFN branch ----
    x = _layernorm_c(y, n2w_ref[...], n2b_ref[...], eps)
    x = jnp.dot(w4_ref[...], x, preferred_element_type=jnp.float32) + b4_ref[...]
    f = x.shape[0]
    g2 = x[:f // 2, :] * x[f // 2:, :]
    x = jnp.dot(w5_ref[...], g2, preferred_element_type=jnp.float32) + b5_ref[...]

    # dropout2 is identity (rate 0.0)
    out_ref[...] = (y + x * gamma_ref[...]).astype(out_ref.dtype)


# ------------------------------- wrapper ------------------------------------

def _border_masks(H, W):
    """Zero-padding masks for the 9 depthwise-3x3 taps, flattened to (9, H*W)."""
    m = np.ones((9, H, W), np.float32)
    k = 0
    for di in (-1, 0, 1):
        for dj in (-1, 0, 1):
            if di == -1:
                m[k, 0, :] = 0.0
            elif di == 1:
                m[k, H - 1, :] = 0.0
            if dj == -1:
                m[k, :, 0] = 0.0
            elif dj == 1:
                m[k, :, W - 1] = 0.0
            k += 1
    return jnp.asarray(m.reshape(9, H * W))


def nafblock_pallas(params, inp, eps=1e-6):
    """NAFBlock forward. inp: (B, C, H, W) float32."""
    B, C, H, W = inp.shape
    HW = H * W
    DW = params["w1"].shape[0]
    FFN = params["w4"].shape[0]

    # NCHW -> (B, C, H*W) is a free reshape (no transpose / pad on the host).
    x = inp.reshape(B, C, HW)
    masks = _border_masks(H, W)

    act_spec = pl.BlockSpec((None, C, HW), lambda b: (b, 0, 0))

    def const(shape):
        return pl.BlockSpec(shape, lambda b: (0, 0))

    # TODO(synk): for production spatial sizes, additionally tile HW (halo rows
    # for the 3x3, two-pass SCA); at these shapes one batch row fits VMEM easily.
    kern = functools.partial(_nafblock_kernel, H, W, eps)
    out = pl.pallas_call(
        kern,
        out_shape=jax.ShapeDtypeStruct((B, C, HW), jnp.float32),
        grid=(B,),
        in_specs=[
            act_spec,                        # inp
            const((9, HW)),                  # border masks
            const((C, 1)), const((C, 1)),    # norm1 w, b
            const((DW, C)), const((DW, 1)),  # conv1 w, b
            const((DW, 9)), const((DW, 1)),  # conv2 (depthwise) w, b
            const((C, C)), const((C, 1)),    # sca w, b
            const((C, C)), const((C, 1)),    # conv3 w, b
            const((C, 1)),                   # beta
            const((C, 1)), const((C, 1)),    # norm2 w, b
            const((FFN, C)), const((FFN, 1)),        # conv4 w, b
            const((C, FFN // 2)), const((C, 1)),     # conv5 w, b
            const((C, 1)),                   # gamma
        ],
        out_specs=act_spec,
        compiler_params=pltpu.CompilerParams(
            dimension_semantics=("parallel",),
            vmem_limit_bytes=32 * 1024 * 1024),
    )(x, masks,
      params["n1_w"], params["n1_b"],
      params["w1"], params["b1"], params["wdw"], params["bdw"],
      params["wsca"], params["bsca"], params["w3"], params["b3"], params["beta"],
      params["n2_w"], params["n2_b"], params["w4"], params["b4"],
      params["w5"], params["b5"], params["gamma"])
    return out.reshape(B, C, H, W)


def init_params(key, c, dw_expand=2, ffn_expand=2):
    dw = c * dw_expand
    ffn = c * ffn_expand
    ks = jax.random.split(key, 18)

    def w(k, shape, scale=0.2):
        return jax.random.normal(k, shape, jnp.float32) * scale

    return {
        # norm params randomized (PyTorch default is ones/zeros) to exercise the path
        "n1_w": 1.0 + w(ks[0], (c, 1), 0.1),
        "n1_b": w(ks[1], (c, 1), 0.1),
        "w1": w(ks[2], (dw, c)),      # Conv2d(c, 2c, 1) weight[:, :, 0, 0]
        "b1": w(ks[3], (dw, 1)),
        "wdw": w(ks[4], (dw, 9)),     # depthwise weight[:, 0].reshape(dw, 9)
        "bdw": w(ks[5], (dw, 1)),
        "wsca": w(ks[6], (c, c)),
        "bsca": w(ks[7], (c, 1)),
        "w3": w(ks[8], (c, c)),
        "b3": w(ks[9], (c, 1)),
        "beta": w(ks[10], (c, 1), 0.5),   # nonzero so the residual branch matters
        "n2_w": 1.0 + w(ks[11], (c, 1), 0.1),
        "n2_b": w(ks[12], (c, 1), 0.1),
        "w4": w(ks[13], (ffn, c)),
        "b4": w(ks[14], (ffn, 1)),
        "w5": w(ks[15], (c, ffn // 2)),
        "b5": w(ks[16], (c, 1)),
        "gamma": w(ks[17], (c, 1), 0.5),
    }


# --------------------------- pure-JAX reference -----------------------------

def reference_nafblock(params, inp, eps=1e-6):
    B, C, H, W = inp.shape

    def ln(x, wgt, b):
        mu = x.mean(1, keepdims=True)
        var = ((x - mu) ** 2).mean(1, keepdims=True)
        y = (x - mu) / jnp.sqrt(var + eps)
        return wgt.reshape(1, C, 1, 1) * y + b.reshape(1, C, 1, 1)

    def pw(x, wgt, b):
        return jnp.einsum("bihw,oi->bohw", x, wgt) + b.reshape(1, -1, 1, 1)

    def dw3(x, w9, b):
        Cc = x.shape[1]
        wgt = w9.reshape(Cc, 1, 3, 3)
        y = lax.conv_general_dilated(
            x, wgt, (1, 1), ((1, 1), (1, 1)),
            dimension_numbers=("NCHW", "OIHW", "NCHW"),
            feature_group_count=Cc)
        return y + b.reshape(1, Cc, 1, 1)

    x = ln(inp, params["n1_w"], params["n1_b"])
    x = pw(x, params["w1"], params["b1"])
    x = dw3(x, params["wdw"], params["bdw"])
    half = x.shape[1] // 2
    x = x[:, :half] * x[:, half:]
    pooled = x.mean(axis=(2, 3), keepdims=True)
    s = jnp.einsum("bihw,oi->bohw", pooled, params["wsca"]) \
        + params["bsca"].reshape(1, -1, 1, 1)
    x = x * s
    x = pw(x, params["w3"], params["b3"])
    y = inp + x * params["beta"].reshape(1, C, 1, 1)

    x = pw(ln(y, params["n2_w"], params["n2_b"]), params["w4"], params["b4"])
    half = x.shape[1] // 2
    x = x[:, :half] * x[:, half:]
    x = pw(x, params["w5"], params["b5"])
    return y + x * params["gamma"].reshape(1, C, 1, 1)


# ----------------------------------- main ------------------------------------

if __name__ == "__main__":
    c = 4
    B, H, W = 2, 16, 16

    key = jax.random.PRNGKey(0)
    kp, kx = jax.random.split(key)
    params = init_params(kp, c)
    inp = jax.random.normal(kx, (B, c, H, W), jnp.float32)

    out = nafblock_pallas(params, inp)
    out = jax.block_until_ready(out)

    ref = reference_nafblock(params, inp)
    assert out.shape == (B, c, H, W), out.shape
    assert bool(jnp.all(jnp.isfinite(out)))
    assert bool(jnp.allclose(out, ref, atol=1e-3, rtol=1e-3)), \
        float(jnp.max(jnp.abs(out - ref)))
    print("KERNEL_OK")
</pallas_src>

<mosaic_0001>
module attributes {stable_mosaic.version = 11 : i64} {
  func.func @_nafblock_kernel(%arg0: i32, %arg1: memref<1x4x256xf32, #tpu.memory_space<vmem>>, %arg2: memref<9x256xf32, #tpu.memory_space<vmem>>, %arg3: memref<4x1xf32, #tpu.memory_space<vmem>>, %arg4: memref<4x1xf32, #tpu.memory_space<vmem>>, %arg5: memref<8x4xf32, #tpu.memory_space<vmem>>, %arg6: memref<8x1xf32, #tpu.memory_space<vmem>>, %arg7: memref<8x9xf32, #tpu.memory_space<vmem>>, %arg8: memref<8x1xf32, #tpu.memory_space<vmem>>, %arg9: memref<4x4xf32, #tpu.memory_space<vmem>>, %arg10: memref<4x1xf32, #tpu.memory_space<vmem>>, %arg11: memref<4x4xf32, #tpu.memory_space<vmem>>, %arg12: memref<4x1xf32, #tpu.memory_space<vmem>>, %arg13: memref<4x1xf32, #tpu.memory_space<vmem>>, %arg14: memref<4x1xf32, #tpu.memory_space<vmem>>, %arg15: memref<4x1xf32, #tpu.memory_space<vmem>>, %arg16: memref<8x4xf32, #tpu.memory_space<vmem>>, %arg17: memref<8x1xf32, #tpu.memory_space<vmem>>, %arg18: memref<4x4xf32, #tpu.memory_space<vmem>>, %arg19: memref<4x1xf32, #tpu.memory_space<vmem>>, %arg20: memref<4x1xf32, #tpu.memory_space<vmem>>, %arg21: memref<1x4x256xf32, #tpu.memory_space<vmem>>) attributes {dimension_semantics = [#tpu.dimension_semantics<parallel>], iteration_bounds = array<i64: 2>, scalar_prefetch = 0 : i64, scratch_operands = 0 : i64, tpu.core_type = #tpu.core_type<tc>, window_params = [{transform_indices = @transform_0, window_bounds = array<i64: 1, 4, 256>}, {pipeline_mode = #tpu.pipeline_mode<synchronous>, transform_indices = @transform_1, window_bounds = array<i64: 9, 256>}, {pipeline_mode = #tpu.pipeline_mode<synchronous>, transform_indices = @transform_2, window_bounds = array<i64: 4, 1>}, {pipeline_mode = #tpu.pipeline_mode<synchronous>, transform_indices = @transform_3, window_bounds = array<i64: 4, 1>}, {pipeline_mode = #tpu.pipeline_mode<synchronous>, transform_indices = @transform_4, window_bounds = array<i64: 8, 4>}, {pipeline_mode = #tpu.pipeline_mode<synchronous>, transform_indices = @transform_5, window_bounds = array<i64: 8, 1>}, {pipeline_mode = #tpu.pipeline_mode<synchronous>, transform_indices = @transform_6, window_bounds = array<i64: 8, 9>}, {pipeline_mode = #tpu.pipeline_mode<synchronous>, transform_indices = @transform_7, window_bounds = array<i64: 8, 1>}, {pipeline_mode = #tpu.pipeline_mode<synchronous>, transform_indices = @transform_8, window_bounds = array<i64: 4, 4>}, {pipeline_mode = #tpu.pipeline_mode<synchronous>, transform_indices = @transform_9, window_bounds = array<i64: 4, 1>}, {pipeline_mode = #tpu.pipeline_mode<synchronous>, transform_indices = @transform_10, window_bounds = array<i64: 4, 4>}, {pipeline_mode = #tpu.pipeline_mode<synchronous>, transform_indices = @transform_11, window_bounds = array<i64: 4, 1>}, {pipeline_mode = #tpu.pipeline_mode<synchronous>, transform_indices = @transform_12, window_bounds = array<i64: 4, 1>}, {pipeline_mode = #tpu.pipeline_mode<synchronous>, transform_indices = @transform_13, window_bounds = array<i64: 4, 1>}, {pipeline_mode = #tpu.pipeline_mode<synchronous>, transform_indices = @transform_14, window_bounds = array<i64: 4, 1>}, {pipeline_mode = #tpu.pipeline_mode<synchronous>, transform_indices = @transform_15, window_bounds = array<i64: 8, 4>}, {pipeline_mode = #tpu.pipeline_mode<synchronous>, transform_indices = @transform_16, window_bounds = array<i64: 8, 1>}, {pipeline_mode = #tpu.pipeline_mode<synchronous>, transform_indices = @transform_17, window_bounds = array<i64: 4, 4>}, {pipeline_mode = #tpu.pipeline_mode<synchronous>, transform_indices = @transform_18, window_bounds = array<i64: 4, 1>}, {pipeline_mode = #tpu.pipeline_mode<synchronous>, transform_indices = @transform_19, window_bounds = array<i64: 4, 1>}, {transform_indices = @transform_20, window_bounds = array<i64: 1, 4, 256>}]} {
    %c0 = arith.constant 0 : index
    %c0_0 = arith.constant 0 : index
    %c0_1 = arith.constant 0 : index
    %0 = vector.load %arg1[%c0, %c0_0, %c0_1] : memref<1x4x256xf32, #tpu.memory_space<vmem>>, vector<1x4x256xf32>
    %1 = vector.shape_cast %0 : vector<1x4x256xf32> to vector<4x256xf32>
    %c0_2 = arith.constant 0 : index
    %c0_3 = arith.constant 0 : index
    %2 = vector.load %arg3[%c0_2, %c0_3] : memref<4x1xf32, #tpu.memory_space<vmem>>, vector<4x1xf32>
    %c0_4 = arith.constant 0 : index
    %c0_5 = arith.constant 0 : index
    %3 = vector.load %arg4[%c0_4, %c0_5] : memref<4x1xf32, #tpu.memory_space<vmem>>, vector<4x1xf32>
    %cst = arith.constant dense<0.000000e+00> : vector<256xf32>
    %4 = vector.multi_reduction <add>, %1, %cst [0] : vector<4x256xf32> to vector<256xf32>
    %5 = vector.shape_cast %4 : vector<256xf32> to vector<1x256xf32>
    %cst_6 = arith.constant 4.000000e+00 : f32
    %6 = vector.broadcast %cst_6 : f32 to vector<1x256xf32>
    %7 = arith.divf %5, %6 : vector<1x256xf32>
    %8 = vector.broadcast %7 : vector<1x256xf32> to vector<4x256xf32>
    %9 = arith.subf %1, %8 : vector<4x256xf32>
    %10 = arith.mulf %9, %9 : vector<4x256xf32>
    %cst_7 = arith.constant dense<0.000000e+00> : vector<256xf32>
    %11 = vector.multi_reduction <add>, %10, %cst_7 [0] : vector<4x256xf32> to vector<256xf32>
    %12 = vector.shape_cast %11 : vector<256xf32> to vector<1x256xf32>
    %cst_8 = arith.constant 4.000000e+00 : f32
    %13 = vector.broadcast %cst_8 : f32 to vector<1x256xf32>
    %14 = arith.divf %12, %13 : vector<1x256xf32>
    %cst_9 = arith.constant 9.99999997E-7 : f32
    %15 = vector.broadcast %cst_9 : f32 to vector<1x256xf32>
    %16 = arith.addf %14, %15 : vector<1x256xf32>
    %17 = math.rsqrt %16 : vector<1x256xf32>
    %18 = vector.broadcast %17 : vector<1x256xf32> to vector<4x256xf32>
    %19 = arith.mulf %9, %18 : vector<4x256xf32>
    %20 = vector.broadcast %2 : vector<4x1xf32> to vector<4x256xf32>
    %21 = arith.mulf %20, %19 : vector<4x256xf32>
    %22 = vector.broadcast %3 : vector<4x1xf32> to vector<4x256xf32>
    %23 = arith.addf %21, %22 : vector<4x256xf32>
    %c0_10 = arith.constant 0 : index
    %c0_11 = arith.constant 0 : index
    %24 = vector.load %arg5[%c0_10, %c0_11] : memref<8x4xf32, #tpu.memory_space<vmem>>, vector<8x4xf32>
    %cst_12 = arith.constant dense<0.000000e+00> : vector<8x256xf32>
    %25 = tpu.matmul %24, %23, %cst_12 {dimension_numbers = #tpu.dot_dimension_numbers<[1], [0], [0], [1], [0, 0, 1, 1], [], []>} : vector<8x4xf32>, vector<4x256xf32>, vector<8x256xf32> -> vector<8x256xf32>
    %c0_13 = arith.constant 0 : index
    %c0_14 = arith.constant 0 : index
    %26 = vector.load %arg6[%c0_13, %c0_14] : memref<8x1xf32, #tpu.memory_space<vmem>>, vector<8x1xf32>
    %27 = vector.broadcast %26 : vector<8x1xf32> to vector<8x256xf32>
    %28 = arith.addf %25, %27 : vector<8x256xf32>
    %c0_15 = arith.constant 0 : index
    %c0_16 = arith.constant 0 : index
    %29 = vector.load %arg7[%c0_15, %c0_16] : memref<8x9xf32, #tpu.memory_space<vmem>>, vector<8x9xf32>
    %c0_17 = arith.constant 0 : index
    %c0_18 = arith.constant 0 : index
    %30 = vector.load %arg2[%c0_17, %c0_18] : memref<9x256xf32, #tpu.memory_space<vmem>>, vector<9x256xf32>
    %cst_19 = arith.constant 0.000000e+00 : f32
    %31 = vector.broadcast %cst_19 : f32 to vector<8x256xf32>
    %c17_i32 = arith.constant 17 : i32
    %32 = tpu.dynamic_rotate %28 by %c17_i32 dim 1 : vector<8x256xf32>, i32 -> vector<8x256xf32>
    %33 = vector.extract_strided_slice %30 {offsets = [0, 0], sizes = [1, 256], strides = [1, 1]} : vector<9x256xf32> to vector<1x256xf32>
    %34 = vector.broadcast %33 : vector<1x256xf32> to vector<8x256xf32>
    %35 = arith.mulf %32, %34 : vector<8x256xf32>
    %36 = vector.extract_strided_slice %29 {offsets = [0, 0], sizes = [8, 1], strides = [1, 1]} : vector<8x9xf32> to vector<8x1xf32>
    %37 = vector.broadcast %36 : vector<8x1xf32> to vector<8x256xf32>
    %38 = arith.mulf %35, %37 : vector<8x256xf32>
    %39 = arith.addf %31, %38 : vector<8x256xf32>
    %c16_i32 = arith.constant 16 : i32
    %40 = tpu.dynamic_rotate %28 by %c16_i32 dim 1 : vector<8x256xf32>, i32 -> vector<8x256xf32>
    %41 = vector.extract_strided_slice %30 {offsets = [1, 0], sizes = [1, 256], strides = [1, 1]} : vector<9x256xf32> to vector<1x256xf32>
    %42 = vector.broadcast %41 : vector<1x256xf32> to vector<8x256xf32>
    %43 = arith.mulf %40, %42 : vector<8x256xf32>
    %44 = vector.extract_strided_slice %29 {offsets = [0, 1], sizes = [8, 1], strides = [1, 1]} : vector<8x9xf32> to vector<8x1xf32>
    %45 = vector.broadcast %44 : vector<8x1xf32> to vector<8x256xf32>
    %46 = arith.mulf %43, %45 : vector<8x256xf32>
    %47 = arith.addf %39, %46 : vector<8x256xf32>
    %c15_i32 = arith.constant 15 : i32
    %48 = tpu.dynamic_rotate %28 by %c15_i32 dim 1 : vector<8x256xf32>, i32 -> vector<8x256xf32>
    %49 = vector.extract_strided_slice %30 {offsets = [2, 0], sizes = [1, 256], strides = [1, 1]} : vector<9x256xf32> to vector<1x256xf32>
    %50 = vector.broadcast %49 : vector<1x256xf32> to vector<8x256xf32>
    %51 = arith.mulf %48, %50 : vector<8x256xf32>
    %52 = vector.extract_strided_slice %29 {offsets = [0, 2], sizes = [8, 1], strides = [1, 1]} : vector<8x9xf32> to vector<8x1xf32>
    %53 = vector.broadcast %52 : vector<8x1xf32> to vector<8x256xf32>
    %54 = arith.mulf %51, %53 : vector<8x256xf32>
    %55 = arith.addf %47, %54 : vector<8x256xf32>
    %c1_i32 = arith.constant 1 : i32
    %56 = tpu.dynamic_rotate %28 by %c1_i32 dim 1 : vector<8x256xf32>, i32 -> vector<8x256xf32>
    %57 = vector.extract_strided_slice %30 {offsets = [3, 0], sizes = [1, 256], strides = [1, 1]} : vector<9x256xf32> to vector<1x256xf32>
    %58 = vector.broadcast %57 : vector<1x256xf32> to vector<8x256xf32>
    %59 = arith.mulf %56, %58 : vector<8x256xf32>
    %60 = vector.extract_strided_slice %29 {offsets = [0, 3], sizes = [8, 1], strides = [1, 1]} : vector<8x9xf32> to vector<8x1xf32>
    %61 = vector.broadcast %60 : vector<8x1xf32> to vector<8x256xf32>
    %62 = arith.mulf %59, %61 : vector<8x256xf32>
    %63 = arith.addf %55, %62 : vector<8x256xf32>
    %64 = vector.extract_strided_slice %30 {offsets = [4, 0], sizes = [1, 256], strides = [1, 1]} : vector<9x256xf32> to vector<1x256xf32>
    %65 = vector.broadcast %64 : vector<1x256xf32> to vector<8x256xf32>
    %66 = arith.mulf %28, %65 : vector<8x256xf32>
    %67 = vector.extract_strided_slice %29 {offsets = [0, 4], sizes = [8, 1], strides = [1, 1]} : vector<8x9xf32> to vector<8x1xf32>
    %68 = vector.broadcast %67 : vector<8x1xf32> to vector<8x256xf32>
    %69 = arith.mulf %66, %68 : vector<8x256xf32>
    %70 = arith.addf %63, %69 : vector<8x256xf32>
    %c255_i32 = arith.constant 255 : i32
    %71 = tpu.dynamic_rotate %28 by %c255_i32 dim 1 : vector<8x256xf32>, i32 -> vector<8x256xf32>
    %72 = vector.extract_strided_slice %30 {offsets = [5, 0], sizes = [1, 256], strides = [1, 1]} : vector<9x256xf32> to vector<1x256xf32>
    %73 = vector.broadcast %72 : vector<1x256xf32> to vector<8x256xf32>
    %74 = arith.mulf %71, %73 : vector<8x256xf32>
    %75 = vector.extract_strided_slice %29 {offsets = [0, 5], sizes = [8, 1], strides = [1, 1]} : vector<8x9xf32> to vector<8x1xf32>
    %76 = vector.broadcast %75 : vector<8x1xf32> to vector<8x256xf32>
    %77 = arith.mulf %74, %76 : vector<8x256xf32>
    %78 = arith.addf %70, %77 : vector<8x256xf32>
    %c241_i32 = arith.constant 241 : i32
    %79 = tpu.dynamic_rotate %28 by %c241_i32 dim 1 : vector<8x256xf32>, i32 -> vector<8x256xf32>
    %80 = vector.extract_strided_slice %30 {offsets = [6, 0], sizes = [1, 256], strides = [1, 1]} : vector<9x256xf32> to vector<1x256xf32>
    %81 = vector.broadcast %80 : vector<1x256xf32> to vector<8x256xf32>
    %82 = arith.mulf %79, %81 : vector<8x256xf32>
    %83 = vector.extract_strided_slice %29 {offsets = [0, 6], sizes = [8, 1], strides = [1, 1]} : vector<8x9xf32> to vector<8x1xf32>
    %84 = vector.broadcast %83 : vector<8x1xf32> to vector<8x256xf32>
    %85 = arith.mulf %82, %84 : vector<8x256xf32>
    %86 = arith.addf %78, %85 : vector<8x256xf32>
    %c240_i32 = arith.constant 240 : i32
    %87 = tpu.dynamic_rotate %28 by %c240_i32 dim 1 : vector<8x256xf32>, i32 -> vector<8x256xf32>
    %88 = vector.extract_strided_slice %30 {offsets = [7, 0], sizes = [1, 256], strides = [1, 1]} : vector<9x256xf32> to vector<1x256xf32>
    %89 = vector.broadcast %88 : vector<1x256xf32> to vector<8x256xf32>
    %90 = arith.mulf %87, %89 : vector<8x256xf32>
    %91 = vector.extract_strided_slice %29 {offsets = [0, 7], sizes = [8, 1], strides = [1, 1]} : vector<8x9xf32> to vector<8x1xf32>
    %92 = vector.broadcast %91 : vector<8x1xf32> to vector<8x256xf32>
    %93 = arith.mulf %90, %92 : vector<8x256xf32>
    %94 = arith.addf %86, %93 : vector<8x256xf32>
    %c239_i32 = arith.constant 239 : i32
    %95 = tpu.dynamic_rotate %28 by %c239_i32 dim 1 : vector<8x256xf32>, i32 -> vector<8x256xf32>
    %96 = vector.extract_strided_slice %30 {offsets = [8, 0], sizes = [1, 256], strides = [1, 1]} : vector<9x256xf32> to vector<1x256xf32>
    %97 = vector.broadcast %96 : vector<1x256xf32> to vector<8x256xf32>
    %98 = arith.mulf %95, %97 : vector<8x256xf32>
    %99 = vector.extract_strided_slice %29 {offsets = [0, 8], sizes = [8, 1], strides = [1, 1]} : vector<8x9xf32> to vector<8x1xf32>
    %100 = vector.broadcast %99 : vector<8x1xf32> to vector<8x256xf32>
    %101 = arith.mulf %98, %100 : vector<8x256xf32>
    %102 = arith.addf %94, %101 : vector<8x256xf32>
    %c0_20 = arith.constant 0 : index
    %c0_21 = arith.constant 0 : index
    %103 = vector.load %arg8[%c0_20, %c0_21] : memref<8x1xf32, #tpu.memory_space<vmem>>, vector<8x1xf32>
    %104 = vector.broadcast %103 : vector<8x1xf32> to vector<8x256xf32>
    %105 = arith.addf %102, %104 : vector<8x256xf32>
    %106 = vector.extract_strided_slice %105 {offsets = [0, 0], sizes = [4, 256], strides = [1, 1]} : vector<8x256xf32> to vector<4x256xf32>
    %107 = vector.extract_strided_slice %105 {offsets = [4, 0], sizes = [4, 256], strides = [1, 1]} : vector<8x256xf32> to vector<4x256xf32>
    %108 = arith.mulf %106, %107 : vector<4x256xf32>
    %c0_22 = arith.constant 0 : index
    %c0_23 = arith.constant 0 : index
    %109 = vector.load %arg9[%c0_22, %c0_23] : memref<4x4xf32, #tpu.memory_space<vmem>>, vector<4x4xf32>
    %cst_24 = arith.constant dense<0.000000e+00> : vector<4x256xf32>
    %110 = tpu.matmul %109, %108, %cst_24 {dimension_numbers = #tpu.dot_dimension_numbers<[1], [0], [0], [1], [0, 0, 1, 1], [], []>} : vector<4x4xf32>, vector<4x256xf32>, vector<4x256xf32> -> vector<4x256xf32>
    %cst_25 = arith.constant dense<0.000000e+00> : vector<4xf32>
    %111 = vector.multi_reduction <add>, %110, %cst_25 [1] : vector<4x256xf32> to vector<4xf32>
    %112 = vector.shape_cast %111 : vector<4xf32> to vector<4x1xf32>
    %cst_26 = arith.constant 2.560000e+02 : f32
    %113 = vector.broadcast %cst_26 : f32 to vector<4x1xf32>
    %114 = arith.divf %112, %113 : vector<4x1xf32>
    %c0_27 = arith.constant 0 : index
    %c0_28 = arith.constant 0 : index
    %115 = vector.load %arg10[%c0_27, %c0_28] : memref<4x1xf32, #tpu.memory_space<vmem>>, vector<4x1xf32>
    %116 = arith.addf %114, %115 : vector<4x1xf32>
    %117 = vector.broadcast %116 : vector<4x1xf32> to vector<4x256xf32>
    %118 = arith.mulf %108, %117 : vector<4x256xf32>
    %c0_29 = arith.constant 0 : index
    %c0_30 = arith.constant 0 : index
    %119 = vector.load %arg11[%c0_29, %c0_30] : memref<4x4xf32, #tpu.memory_space<vmem>>, vector<4x4xf32>
    %cst_31 = arith.constant dense<0.000000e+00> : vector<4x256xf32>
    %120 = tpu.matmul %119, %118, %cst_31 {dimension_numbers = #tpu.dot_dimension_numbers<[1], [0], [0], [1], [0, 0, 1, 1], [], []>} : vector<4x4xf32>, vector<4x256xf32>, vector<4x256xf32> -> vector<4x256xf32>
    %c0_32 = arith.constant 0 : index
    %c0_33 = arith.constant 0 : index
    %121 = vector.load %arg12[%c0_32, %c0_33] : memref<4x1xf32, #tpu.memory_space<vmem>>, vector<4x1xf32>
    %122 = vector.broadcast %121 : vector<4x1xf32> to vector<4x256xf32>
    %123 = arith.addf %120, %122 : vector<4x256xf32>
    %c0_34 = arith.constant 0 : index
    %c0_35 = arith.constant 0 : index
    %124 = vector.load %arg13[%c0_34, %c0_35] : memref<4x1xf32, #tpu.memory_space<vmem>>, vector<4x1xf32>
    %125 = vector.broadcast %124 : vector<4x1xf32> to vector<4x256xf32>
    %126 = arith.mulf %123, %125 : vector<4x256xf32>
    %127 = arith.addf %1, %126 : vector<4x256xf32>
    %c0_36 = arith.constant 0 : index
    %c0_37 = arith.constant 0 : index
    %128 = vector.load %arg14[%c0_36, %c0_37] : memref<4x1xf32, #tpu.memory_space<vmem>>, vector<4x1xf32>
    %c0_38 = arith.constant 0 : index
    %c0_39 = arith.constant 0 : index
    %129 = vector.load %arg15[%c0_38, %c0_39] : memref<4x1xf32, #tpu.memory_space<vmem>>, vector<4x1xf32>
    %cst_40 = arith.constant dense<0.000000e+00> : vector<256xf32>
    %130 = vector.multi_reduction <add>, %127, %cst_40 [0] : vector<4x256xf32> to vector<256xf32>
    %131 = vector.shape_cast %130 : vector<256xf32> to vector<1x256xf32>
    %cst_41 = arith.constant 4.000000e+00 : f32
    %132 = vector.broadcast %cst_41 : f32 to vector<1x256xf32>
    %133 = arith.divf %131, %132 : vector<1x256xf32>
    %134 = vector.broadcast %133 : vector<1x256xf32> to vector<4x256xf32>
    %135 = arith.subf %127, %134 : vector<4x256xf32>
    %136 = arith.mulf %135, %135 : vector<4x256xf32>
    %cst_42 = arith.constant dense<0.000000e+00> : vector<256xf32>
    %137 = vector.multi_reduction <add>, %136, %cst_42 [0] : vector<4x256xf32> to vector<256xf32>
    %138 = vector.shape_cast %137 : vector<256xf32> to vector<1x256xf32>
    %cst_43 = arith.constant 4.000000e+00 : f32
    %139 = vector.broadcast %cst_43 : f32 to vector<1x256xf32>
    %140 = arith.divf %138, %139 : vector<1x256xf32>
    %cst_44 = arith.constant 9.99999997E-7 : f32
    %141 = vector.broadcast %cst_44 : f32 to vector<1x256xf32>
    %142 = arith.addf %140, %141 : vector<1x256xf32>
    %143 = math.rsqrt %142 : vector<1x256xf32>
    %144 = vector.broadcast %143 : vector<1x256xf32> to vector<4x256xf32>
    %145 = arith.mulf %135, %144 : vector<4x256xf32>
    %146 = vector.broadcast %128 : vector<4x1xf32> to vector<4x256xf32>
    %147 = arith.mulf %146, %145 : vector<4x256xf32>
    %148 = vector.broadcast %129 : vector<4x1xf32> to vector<4x256xf32>
    %149 = arith.addf %147, %148 : vector<4x256xf32>
    %c0_45 = arith.constant 0 : index
    %c0_46 = arith.constant 0 : index
    %150 = vector.load %arg16[%c0_45, %c0_46] : memref<8x4xf32, #tpu.memory_space<vmem>>, vector<8x4xf32>
    %cst_47 = arith.constant dense<0.000000e+00> : vector<8x256xf32>
    %151 = tpu.matmul %150, %149, %cst_47 {dimension_numbers = #tpu.dot_dimension_numbers<[1], [0], [0], [1], [0, 0, 1, 1], [], []>} : vector<8x4xf32>, vector<4x256xf32>, vector<8x256xf32> -> vector<8x256xf32>
    %c0_48 = arith.constant 0 : index
    %c0_49 = arith.constant 0 : index
    %152 = vector.load %arg17[%c0_48, %c0_49] : memref<8x1xf32, #tpu.memory_space<vmem>>, vector<8x1xf32>
    %153 = vector.broadcast %152 : vector<8x1xf32> to vector<8x256xf32>
    %154 = arith.addf %151, %153 : vector<8x256xf32>
    %155 = vector.extract_strided_slice %154 {offsets = [0, 0], sizes = [4, 256], strides = [1, 1]} : vector<8x256xf32> to vector<4x256xf32>
    %156 = vector.extract_strided_slice %154 {offsets = [4, 0], sizes = [4, 256], strides = [1, 1]} : vector<8x256xf32> to vector<4x256xf32>
    %157 = arith.mulf %155, %156 : vector<4x256xf32>
    %c0_50 = arith.constant 0 : index
    %c0_51 = arith.constant 0 : index
    %158 = vector.load %arg18[%c0_50, %c0_51] : memref<4x4xf32, #tpu.memory_space<vmem>>, vector<4x4xf32>
    %cst_52 = arith.constant dense<0.000000e+00> : vector<4x256xf32>
    %159 = tpu.matmul %158, %157, %cst_52 {dimension_numbers = #tpu.dot_dimension_numbers<[1], [0], [0], [1], [0, 0, 1, 1], [], []>} : vector<4x4xf32>, vector<4x256xf32>, vector<4x256xf32> -> vector<4x256xf32>
    %c0_53 = arith.constant 0 : index
    %c0_54 = arith.constant 0 : index
    %160 = vector.load %arg19[%c0_53, %c0_54] : memref<4x1xf32, #tpu.memory_space<vmem>>, vector<4x1xf32>
    %161 = vector.broadcast %160 : vector<4x1xf32> to vector<4x256xf32>
    %162 = arith.addf %159, %161 : vector<4x256xf32>
    %c0_55 = arith.constant 0 : index
    %c0_56 = arith.constant 0 : index
    %163 = vector.load %arg20[%c0_55, %c0_56] : memref<4x1xf32, #tpu.memory_space<vmem>>, vector<4x1xf32>
    %164 = vector.broadcast %163 : vector<4x1xf32> to vector<4x256xf32>
    %165 = arith.mulf %162, %164 : vector<4x256xf32>
    %166 = arith.addf %127, %165 : vector<4x256xf32>
    %c0_57 = arith.constant 0 : index
    %c0_58 = arith.constant 0 : index
    %c0_59 = arith.constant 0 : index
    %167 = vector.load %arg21[%c0_57, %c0_58, %c0_59] : memref<1x4x256xf32, #tpu.memory_space<vmem>>, vector<1x4x256xf32>
    %168 = vector.shape_cast %167 : vector<1x4x256xf32> to vector<4x256xf32>
    %169 = vector.shape_cast %166 : vector<4x256xf32> to vector<1x4x256xf32>
    tpu.vector_store %arg21[%c0_57, %c0_58, %c0_59], %169 {strides = array<i32>} : memref<1x4x256xf32, #tpu.memory_space<vmem>>, vector<1x4x256xf32>,
    return
  }
  func.func @transform_0(%arg0: i32) -> (i32, i32, i32) {
    %c0_i32 = arith.constant 0 : i32
    %c0_i32_0 = arith.constant 0 : i32
    %c0_i32_1 = arith.constant 0 : i32
    return %arg0, %c0_i32, %c0_i32_0 : i32, i32, i32
  }
  func.func @transform_1(%arg0: i32) -> (i32, i32) {
    %c0_i32 = arith.constant 0 : i32
    %c0_i32_0 = arith.constant 0 : i32
    %c0_i32_1 = arith.constant 0 : i32
    return %c0_i32, %c0_i32_0 : i32, i32
  }
  func.func @transform_2(%arg0: i32) -> (i32, i32) {
    %c0_i32 = arith.constant 0 : i32
    %c0_i32_0 = arith.constant 0 : i32
    %c0_i32_1 = arith.constant 0 : i32
    return %c0_i32, %c0_i32_0 : i32, i32
  }
  func.func @transform_3(%arg0: i32) -> (i32, i32) {
    %c0_i32 = arith.constant 0 : i32
    %c0_i32_0 = arith.constant 0 : i32
    %c0_i32_1 = arith.constant 0 : i32
    return %c0_i32, %c0_i32_0 : i32, i32
  }
  func.func @transform_4(%arg0: i32) -> (i32, i32) {
    %c0_i32 = arith.constant 0 : i32
    %c0_i32_0 = arith.constant 0 : i32
    %c0_i32_1 = arith.constant 0 : i32
    return %c0_i32, %c0_i32_0 : i32, i32
  }
  func.func @transform_5(%arg0: i32) -> (i32, i32) {
    %c0_i32 = arith.constant 0 : i32
    %c0_i32_0 = arith.constant 0 : i32
    %c0_i32_1 = arith.constant 0 : i32
    return %c0_i32, %c0_i32_0 : i32, i32
  }
  func.func @transform_6(%arg0: i32) -> (i32, i32) {
    %c0_i32 = arith.constant 0 : i32
    %c0_i32_0 = arith.constant 0 : i32
    %c0_i32_1 = arith.constant 0 : i32
    return %c0_i32, %c0_i32_0 : i32, i32
  }
  func.func @transform_7(%arg0: i32) -> (i32, i32) {
    %c0_i32 = arith.constant 0 : i32
    %c0_i32_0 = arith.constant 0 : i32
    %c0_i32_1 = arith.constant 0 : i32
    return %c0_i32, %c0_i32_0 : i32, i32
  }
  func.func @transform_8(%arg0: i32) -> (i32, i32) {
    %c0_i32 = arith.constant 0 : i32
    %c0_i32_0 = arith.constant 0 : i32
    %c0_i32_1 = arith.constant 0 : i32
    return %c0_i32, %c0_i32_0 : i32, i32
  }
  func.func @transform_9(%arg0: i32) -> (i32, i32) {
    %c0_i32 = arith.constant 0 : i32
    %c0_i32_0 = arith.constant 0 : i32
    %c0_i32_1 = arith.constant 0 : i32
    return %c0_i32, %c0_i32_0 : i32, i32
  }
  func.func @transform_10(%arg0: i32) -> (i32, i32) {
    %c0_i32 = arith.constant 0 : i32
    %c0_i32_0 = arith.constant 0 : i32
    %c0_i32_1 = arith.constant 0 : i32
    return %c0_i32, %c0_i32_0 : i32, i32
  }
  func.func @transform_11(%arg0: i32) -> (i32, i32) {
    %c0_i32 = arith.constant 0 : i32
    %c0_i32_0 = arith.constant 0 : i32
    %c0_i32_1 = arith.constant 0 : i32
    return %c0_i32, %c0_i32_0 : i32, i32
  }
  func.func @transform_12(%arg0: i32) -> (i32, i32) {
    %c0_i32 = arith.constant 0 : i32
    %c0_i32_0 = arith.constant 0 : i32
    %c0_i32_1 = arith.constant 0 : i32
    return %c0_i32, %c0_i32_0 : i32, i32
  }
  func.func @transform_13(%arg0: i32) -> (i32, i32) {
    %c0_i32 = arith.constant 0 : i32
    %c0_i32_0 = arith.constant 0 : i32
    %c0_i32_1 = arith.constant 0 : i32
    return %c0_i32, %c0_i32_0 : i32, i32
  }
  func.func @transform_14(%arg0: i32) -> (i32, i32) {
    %c0_i32 = arith.constant 0 : i32
    %c0_i32_0 = arith.constant 0 : i32
    %c0_i32_1 = arith.constant 0 : i32
    return %c0_i32, %c0_i32_0 : i32, i32
  }
  func.func @transform_15(%arg0: i32) -> (i32, i32) {
    %c0_i32 = arith.constant 0 : i32
    %c0_i32_0 = arith.constant 0 : i32
    %c0_i32_1 = arith.constant 0 : i32
    return %c0_i32, %c0_i32_0 : i32, i32
  }
  func.func @transform_16(%arg0: i32) -> (i32, i32) {
    %c0_i32 = arith.constant 0 : i32
    %c0_i32_0 = arith.constant 0 : i32
    %c0_i32_1 = arith.constant 0 : i32
    return %c0_i32, %c0_i32_0 : i32, i32
  }
  func.func @transform_17(%arg0: i32) -> (i32, i32) {
    %c0_i32 = arith.constant 0 : i32
    %c0_i32_0 = arith.constant 0 : i32
    %c0_i32_1 = arith.constant 0 : i32
    return %c0_i32, %c0_i32_0 : i32, i32
  }
  func.func @transform_18(%arg0: i32) -> (i32, i32) {
    %c0_i32 = arith.constant 0 : i32
    %c0_i32_0 = arith.constant 0 : i32
    %c0_i32_1 = arith.constant 0 : i32
    return %c0_i32, %c0_i32_0 : i32, i32
  }
  func.func @transform_19(%arg0: i32) -> (i32, i32) {
    %c0_i32 = arith.constant 0 : i32
    %c0_i32_0 = arith.constant 0 : i32
    %c0_i32_1 = arith.constant 0 : i32
    return %c0_i32, %c0_i32_0 : i32, i32
  }
  func.func @transform_20(%arg0: i32) -> (i32, i32, i32) {
    %c0_i32 = arith.constant 0 : i32
    %c0_i32_0 = arith.constant 0 : i32
    %c0_i32_1 = arith.constant 0 : i32
    return %arg0, %c0_i32, %c0_i32_0 : i32, i32, i32
  }
}

</mosaic_0001>

<bundles_post_ra>
// kernel: tpu_custom_call.1
= control target key start
LH: loop header
LB: loop body
LE: loop exit
PB: predicated region body
PF: predicated region fallthrough
CT: control target
= control target key end

     0   :  { %s2194_s0 = inlined_call_operand.vmem [shape: f32[2,4,256], index: 0, kind: input, shape index: {}]   ;;  %s2195_s1 = inlined_call_operand.vmem [shape: f32[9,256], index: 1, kind: input, shape index: {}]   ;;  %s2196_s2 = inlined_call_operand.vmem [shape: f32[4,1], index: 2, kind: input, shape index: {}]   ;;  %s2197_s3 = inlined_call_operand.vmem [shape: f32[4,1], index: 3, kind: input, shape index: {}]   ;;  %s2198_s4 = inlined_call_operand.vmem [shape: f32[8,4], index: 4, kind: input, shape index: {}]   ;;  %s2199_s5 = inlined_call_operand.vmem [shape: f32[8,1], index: 5, kind: input, shape index: {}]   ;;  %s2200_s6 = inlined_call_operand.vmem [shape: f32[8,9], index: 6, kind: input, shape index: {}]   ;;  %s2201_s7 = inlined_call_operand.vmem [shape: f32[8,1], index: 7, kind: input, shape index: {}]   ;;  %s2202_s8 = inlined_call_operand.vmem [shape: f32[4,4], index: 8, kind: input, shape index: {}]   ;;  %s2203_s9 = inlined_call_operand.vmem [shape: f32[4,1], index: 9, kind: input, shape index: {}]   ;;  %s2204_s10 = inlined_call_operand.vmem [shape: f32[4,4], index: 10, kind: input, shape index: {}]   ;;  %s2205_s11 = inlined_call_operand.vmem [shape: f32[4,1], index: 11, kind: input, shape index: {}]   ;;  %s2206_s12 = inlined_call_operand.vmem [shape: f32[4,1], index: 12, kind: input, shape index: {}]   ;;  %s2207_s13 = inlined_call_operand.vmem [shape: f32[4,1], index: 13, kind: input, shape index: {}]   ;;  %s2208_s14 = inlined_call_operand.vmem [shape: f32[4,1], index: 14, kind: input, shape index: {}]   ;;  %s2209_s15 = inlined_call_operand.vmem [shape: f32[8,4], index: 15, kind: input, shape index: {}]   ;;  %s2210_s16 = inlined_call_operand.vmem [shape: f32[8,1], index: 16, kind: input, shape index: {}]   ;;  %s2211_s17 = inlined_call_operand.vmem [shape: f32[4,4], index: 17, kind: input, shape index: {}]   ;;  %s2212_s18 = inlined_call_operand.vmem [shape: f32[4,1], index: 18, kind: input, shape index: {}]   ;;  %s2213_s19 = inlined_call_operand.vmem [shape: f32[4,1], index: 19, kind: input, shape index: {}]   ;;  %s2214_s20 = inlined_call_operand.hbm [shape: f32[2,4,256], index: 20, kind: output, shape index: {}]  }
   0x1   :  { %2221 = sst [smem:[#allocation9_spill]] %s2194_s0 }
   0x2   :  { %2222 = sst [smem:[#allocation10_spill]] %s2195_s1 }
   0x3   :  { %2223 = sst [smem:[#allocation11_spill]] %s2196_s2 }
   0x4   :  { %2224 = sst [smem:[#allocation12_spill]] %s2197_s3 }
   0x5   :  { %2225 = sst [smem:[#allocation13_spill]] %s2198_s4 }
   0x6   :  { %2226 = sst [smem:[#allocation14_spill]] %s2199_s5 }
   0x7   :  { %25 = vsyncpa [#allocation3], 0 }
   0x8   :  { %27 = vsyncpa [#allocation3 + $0x1], 0  ;;  %s1868_s1 = smov 0   ;;  %s1870_s22 = smov 0  }
   0x9   :  { %s1872_s23 = smov 0   ;;  %s1874_s24 = smov 0  }
   0xa LB: > { %2227 = sst [smem:[#allocation5_spill]] %s1738_s23  ;;  %s1889_s2 = sadd.s32 4294967295, %s1742_s24   ;;  %s1742_s24 = sphi %s1874_s24, %s2240_s24   ;;  %s1738_s23 = sphi %s1872_s23, %s2242_s23   ;;  %s1734_s22 = sphi %s1870_s22, %s2244_s22   ;;  %s1730_s1 = sphi %s1868_s1, %s2243_s1  }
   0xb   : > { %s1572_s25 = sadd.s32 4294967294, %s1742_s24   ;;  %s1893_s3 = sadd.s32 1, %s1742_s24  }
   0xc   : > { %2228 = sst [smem:[#allocation6_spill]] %s1893_s3  ;;  %s465_s26 = sadd.s32 1, %s1738_s23 }
   0xd   : > { %s462_s27 = ssub.s32 %s1742_s24, %s1893_s3  ;;  %p475_p0 = scmp.ne.s32.totalorder %s1738_s23, %s1734_s22 }
   0xe   : > { %p463_p1 = scmp.eq.s32.totalorder %s462_s27, 0  ;;  %p476_p2 = scmp.eq.s32.totalorder %s1889_s2, 1 }
   0xf   : > { %p481_p3 = scmp.ne.s32.totalorder %s1734_s22, %s1730_s1  ;;  %p482_p4 = scmp.eq.s32.totalorder %s1572_s25, 1 }
  0x10   : > { %s1904_s28 = scalar_select %p463_p1, %s1738_s23, %s465_s26  }
  0x11   : > { %p1906_p5 = por %p476_p2, %p475_p0  ;;  %p1910_p6 = por %p482_p4, %p481_p3 }
  0x12   : > { %2229 = sst [smem:[#allocation7_spill]] %s1904_s28  ;;  %p1575_p7 = scmp.ge.s32.totalorder %s1742_s24, 1 }
  0x13   : > { %s2231_s29 = scalar_select %p1910_p6, 1, 0 }
  0x14   : > { %p565_p8 = scmp.lt.s32.totalorder %s1742_s24, 3 }
  0x15   : > { %2232 = sst [smem:[#allocation8_spill]] %s2231_s29 }
  0x16   : > { %p566_p9 = pnand %p1575_p7, %p565_p8 }
  0x17   : > { %s2233_s21 = sld [smem:[#allocation11_spill]] (!%p566_p9)  ;;  %v1744_v1 = vmov (!%p566_p9), 0   ;;  %s2234_s27 = sld [smem:[#allocation12_spill]] (!%p566_p9)  ;;  %v1745_v3 = vmov (!%p566_p9), 0.0   ;;  %v1934_v5 = vld [vmem:[%s2200_s6] sm:$0xff] (!%p566_p9)  ;;  %v1746_v6 = vmov (!%p566_p9), 1  }
  0x18   : > { %569 = sbr.rel (%p566_p9) target bundleno = 1785 (0x6f9), region = 100  ;;  %1660 = vset.pattern.permute.xlu0 (!%p566_p9), %v1744_v1  ;;  %1661 = vset.pattern.permute.xlu1 (!%p566_p9), %v1744_v1  ;;  %p623_p10 = scmp.lt.s32.totalorder (!%p566_p9), %s1889_s2, 1  ;;  %v1747_v7 = vmov (!%p566_p9), 4   ;;  %v1748_v9 = vmov (!%p566_p9), 2   ;;  %v1749_v11 = vmov (!%p566_p9), 5   ;;  %vm634_vm0 = vcmask (!%p566_p9), 1043456  }
  0x19   : > { %784 = vmatprep.mubr.f32.mxu0 (!%p566_p9), %v1745_v3  ;;  %1107 = vmatprep.mubr.f32.mxu1 (!%p566_p9), %v1745_v3  ;;  %s2235_s5 = sld [smem:[#allocation14_spill]] (!%p566_p9)  ;;  %s2236_s3 = sld [smem:[#allocation9_spill]] (!%p566_p9)  ;;  %v1750_v12 = vmov (!%p566_p9), 3   ;;  %v1751_v17 = vmov (!%p566_p9), 6   ;;  %v1752_v20 = vmov (!%p566_p9), 7   ;;  %vm710_vm1 = vcmask (!%p566_p9), 31744  }
  0x1a   : > { %s1755_s30 = smov (!%p566_p9), 17   ;;  %s1756_s0 = smov (!%p566_p9), 113  }
  0x1b   : > { %s1759_s26 = smov (!%p566_p9), 127   ;;  %s1761_s23 = smov (!%p566_p9), 111  }
  0x1d   : > { %v629_v0 = vld [vmem:[%s2233_s21] sm:$0xf] (!%p566_p9)  ;;  %s1757_s21 = smov (!%p566_p9), 16  }
  0x1e   : > { %688 = vperm.xlu0 (!%p566_p9), %1660, %v629_v0   ;;  %v630_v2 = vld [vmem:[%s2234_s27] sm:$0xf] (!%p566_p9)  ;;  %s1760_s27 = smov (!%p566_p9), 112  }
  0x1f   : > { %s624_s28 = scalar_select %p623_p10, %s1889_s2, 1  ;;  %v704_v4 = vld [vmem:[%s2235_s5] sm:$0xff] }
  0x20   : > { %707 = vperm.xlu1 %1661, %v704_v4  }
  0x21   : > { %s1601_s25 = sshll.u32 %s624_s28, 3  ;;  %s2237_s28 = sld [smem:[#allocation13_spill]] }
  0x22   : > { %698 = vperm.xlu0 %1660, %v630_v2   ;;  %s627_s29 = scalar_lea.vmem %s2236_s3, %s1601_s25  ;;  %v1753_v2 = vmov 8   ;;  %s1758_s25 = smov 1  }
  0x23   : > { %v1942_v8 = vld [vmem:[%s627_s29] sm:$0xff]  ;;  %s1754_s29 = smov 15  }
  0x24   : > { %817 = vperm.xlu1 %1661, %v1934_v5   ;;  %v632_v10 = vcombine.high %v1942_v8, %v1942_v8  ;;  %v635_v13 = vsel %vm634_vm0, %v1942_v8, 0.0 }
  0x25   : > { %v636_v15 = vrot.slane %v635_v13, 4 }
  0x26   : > { %1662 = vset.pattern.permute.xlu0 %v1746_v6  ;;  %v642_v14 = vsel %vm634_vm0, %v632_v10, 0.0 }
  0x27   : > { %842 = vperm.xlu0 %1662, %v1934_v5   ;;  %v643_v16 = vrot.slane %v642_v14, 4  ;;  %v637_v18 = vadd.f32 %v636_v15, %v635_v13  ;;  %v703_v0 = vld [vmem:[%s2237_s28] sm:$0xff] }
  0x28   : > { %1663 = vset.pattern.permute.xlu1 %v1748_v9 }
  0x29   : > { %867 = vperm.xlu1 %1663, %v1934_v5   ;;  %v644_v19 = vadd.f32 %v643_v16, %v642_v14  ;;  %v638_v21 = vrot.slane %v637_v18, 2 }
  0x2b   : > { %1665 = vset.pattern.permute.xlu0 %v1747_v7  ;;  %v645_v22 = vrot.slane %v644_v19, 2  ;;  %v639_v23 = vadd.f32 %v638_v21, %v637_v18 }
  0x2c   : > { %910 = vperm.xlu0 %1665, %v1934_v5  }
  0x2d   : > { %1664 = vset.pattern.permute.xlu1 %v1750_v12  ;;  %v646_v24 = vadd.f32 %v645_v22, %v644_v19  ;;  %v640_v25 = vrot.slane %v639_v23, 1  ;;  %v800_v22 = vlaneseq }
  0x2e   : > { %892 = vperm.xlu1 %1664, %v1934_v5  }
  0x2f   : > { %v647_v26 = vrot.slane %v646_v24, 1  ;;  %v641_v27 = vadd.f32 %v640_v25, %v639_v23  ;;  %v2001_v25 = vshrl.u32 %v800_v22, 7 }
  0x30   : > { %1666 = vset.pattern.permute.xlu0 %v1749_v11  ;;  %v1017_v11 = vld [vmem:[%s2201_s7] sm:$0xff] }
  0x31   : > { %935 = vperm.xlu0 %1666, %v1934_v5   ;;  %v648_v28 = vadd.f32 %v647_v26, %v646_v24  ;;  %v650_v29 = vmul.f32 0.25, %v641_v27  ;;  %v2003_v26 = vand.u32 127, %v800_v22  ;;  %v807_v27 = vsub.s32 0, %v2001_v25 }
  0x32   : > { %1667 = vset.pattern.permute.xlu1 %v1751_v17 }
  0x33   : > { %960 = vperm.xlu1 %1667, %v1934_v5   ;;  %v651_v30 = vmul.f32 0.25, %v648_v28  ;;  %v833_v28 = vsub.s32 1, %v2001_v25  ;;  %vm828_vm2 = vcmp.lt.s32.totalorder %v2003_v26, 16  ;;  %vm802_vm3 = vcmp.lt.s32.totalorder %v2003_v26, 17 }
  0x34   : > { %vm853_vm4 = vcmp.lt.s32.totalorder %v2003_v26, 15  ;;  %vm878_vm5 = vcmp.lt.s32.totalorder %v2003_v26, 1  ;;  %vm946_vm6 = vcmp.lt.s32.totalorder %v2003_v26, 113  ;;  %vm971_vm7 = vcmp.lt.s32.totalorder %v2003_v26, 112 }
  0x35   : > { %v654_v31 = vcombine.low %v650_v29, %v651_v30  ;;  %1669 = vset.pattern.permute.xlu0 %v1753_v2  ;;  %v858_v30 = vsub.s32 2, %v2001_v25  ;;  %vm921_vm8 = vcmp.lt.s32.totalorder %v2003_v26, 127  ;;  %vm996_vm9 = vcmp.lt.s32.totalorder %v2003_v26, 111 }
  0x37   : > { %1668 = vset.pattern.permute.xlu1 %v1752_v20  ;;  %v656_v32 = vsub.f32 %v1942_v8, %v654_v31 }
  0x38   : > { %985 = vperm.xlu1 %1668, %v1934_v5  }
  0x39   : > { %v657_v33 = vmul.f32 %v656_v32, %v656_v32 }
  0x3b   : > { %v659_v34 = vcombine.high %v657_v33, %v657_v33  ;;  %v661_v35 = vsel %vm634_vm0, %v657_v33, 0.0 }
  0x3c   : > { %v662_v37 = vrot.slane %v661_v35, 4 }
  0x3d   : > { %v668_v36 = vsel %vm634_vm0, %v659_v34, 0.0 }
  0x3e   : > { %v669_v38 = vrot.slane %v668_v36, 4  ;;  %v663_v39 = vadd.f32 %v662_v37, %v661_v35 }
  0x40   : > { %v670_v40 = vadd.f32 %v669_v38, %v668_v36  ;;  %v664_v41 = vrot.slane %v663_v39, 2 }
  0x42   : > { %v671_v42 = vrot.slane %v670_v40, 2  ;;  %v665_v43 = vadd.f32 %v664_v41, %v663_v39 }
  0x44   : > { %v672_v44 = vadd.f32 %v671_v42, %v670_v40  ;;  %v666_v45 = vrot.slane %v665_v43, 1 }
  0x46   : > { %v673_v46 = vrot.slane %v672_v44, 1  ;;  %v667_v47 = vadd.f32 %v666_v45, %v665_v43  ;;  %v883_v45 = vsub.s32 3, %v2001_v25 }
  0x48   : > { %v674_v48 = vadd.f32 %v673_v46, %v672_v44  ;;  %v675_v49 = vmul.f32 0.25, %v667_v47  ;;  %v901_v46 = vsub.s32 4, %v2001_v25 }
  0x4a   : > { %v676_v50 = vmul.f32 0.25, %v674_v48  ;;  %v677_v51 = vadd.f32 1e-06, %v675_v49 }
  0x4c   : > { %v678_v52 = vadd.f32 1e-06, %v676_v50  ;;  %1672 = vrsqrt.f32 %v677_v51 }
  0x4e   : > { %1674 = vrsqrt.f32 %v678_v52 }
  0x56   : > { %v1673_v53 = vpop.eup %1672 }
  0x58   : > { %v1675_v54 = vpop.eup %1674 }
  0x59   : > { %v683_v55 = vcombine.low %v1673_v53, %v1675_v54 }
  0x5b   : > { %v685_v56 = vmul.f32 %v683_v55, %v656_v32 }
  0x5d   : > { %v692_v57 = vcombine.high %v685_v56, %v685_v56 }
  0x9d   : > { %v689_v58 = vpop.permute.xlu0 %688 }
  0x9e   : > { %v694_v59 = vmul.f32 %v689_v58, %v685_v56  ;;  %v695_v60 = vmul.f32 %v692_v57, %v689_v58 }
  0x9f   : > { %v708_v4 = vpop.permute.xlu1 %707 }
  0xa1   : > { %v699_v61 = vpop.permute.xlu0 %698 }
  0xa2   : > { %v701_v62 = vadd.f32 %v699_v61, %v694_v59  ;;  %v702_v63 = vadd.f32 %v699_v61, %v695_v60 }
  0xa4   : > { %1579 = vmatprep.subr.msk.mxu0 %vm634_vm0, %v702_v63  ;;  %v951_v63 = vsub.s32 6, %v2001_v25 }
  0xa5   : > { %1580 = vmatpush1.msk.msra.mxu0 %vm634_vm0, %v701_v62 }
  0xa6   : > { %1581 = vmatmul.mubr.msk.f32.vlgmr.msra.gmra.mrb[0].mxu0 %vm710_vm1, %v703_v0 }
  0xa7   : > { %1210 = vmatprep.mubr.f32.mxu0 %v1745_v3 }
 0x179   : > { %v786_v6 = vpop.f32.mrb[0].mxu0 }
 0x17a   : > { %v1964_v7 = vadd.f32 %v786_v6, %v708_v4  ;;  %v788_v9 = vpop.f32.mrb[1].mxu0 }
 0x17b   : > { %v1970_v10 = vadd.f32 %v788_v9, %v708_v4 }
 0x17c   : > { %849 = vrot.lane.b32.xlu0 %v1964_v7, %s1754_s29  ;;  %796 = vrot.lane.b32.xlu1 %v1964_v7, %s1755_s30 }
 0x180   : > { %942 = vrot.lane.b32.xlu0 %v1964_v7, %s1756_s0  ;;  %824 = vrot.lane.b32.xlu1 %v1964_v7, %s1757_s21 }
 0x184   : > { %798 = vrot.lane.b32.xlu0 %v1970_v10, %s1755_s30  ;;  %874 = vrot.lane.b32.xlu1 %v1964_v7, %s1758_s25 }
 0x188   : > { %826 = vrot.lane.b32.xlu0 %v1970_v10, %s1757_s21  ;;  %917 = vrot.lane.b32.xlu1 %v1964_v7, %s1759_s26 }
 0x18c   : > { %1010 = vperm.xlu0 %1669, %v1934_v5   ;;  %967 = vrot.lane.b32.xlu1 %v1964_v7, %s1760_s27  ;;  %v818_v5 = vpop.permute.xlu1 %817 }
 0x190   : > { %919 = vrot.lane.b32.xlu0 %v1970_v10, %s1759_s26  ;;  %851 = vrot.lane.b32.xlu1 %v1970_v10, %s1754_s29  ;;  %v868_v12 = vpop.permute.xlu1 %867 }
 0x191   : > { %1670 = vset.pattern.permute.xlu0 %v1744_v1  ;;  %v843_v1 = vpop.permute.xlu0 %842 }
 0x194   : > { %992 = vrot.lane.b32.xlu0 %v1964_v7, %s1761_s23  ;;  %876 = vrot.lane.b32.xlu1 %v1970_v10, %s1758_s25  ;;  %v1989_v13 = vpop.permute.xlu1 %892  ;;  %s620_s25 = sand.u32 1, %s1734_s22  }
 0x195   : > { %v1993_v15 = vpop.permute.xlu0 %910  ;;  %s1576_s26 = sshll.u32 %s620_s25, 3  ;;  %s1499_s30 = scalar_lea.sflag [#allocation3], %s620_s25 }
 0x198   : > { %944 = vrot.lane.b32.xlu1 %v1970_v10, %s1756_s0  ;;  %1020 = vperm.xlu0 %1670, %v1017_v11   ;;  %v1991_v14 = vpop.permute.xlu1 %960  ;;  %s2238_s0 = sld [smem:[#allocation10_spill]] }
 0x199   : > { %v1997_v17 = vpop.permute.xlu0 %935 }
 0x19c   : > { %969 = vrot.lane.b32.xlu1 %v1970_v10, %s1760_s27  ;;  %v1995_v16 = vpop.permute.xlu1 %985  ;;  %s1602_s27 = sshll.u32 %s1889_s2, 7  ;;  %s1762_s2 = smov [#allocation2]  }
 0x19d   : > { %s2152_s29 = scalar_lea.hbm %s2214_s20, %s1602_s27 }
 0x19e   : > { %v2014_v32 = vld [vmem:[%s2238_s0] sm:$0xff]  ;;  %v2019_v33 = vld [vmem:[%s2238_s0 + $0x8] sm:$0xff] }
 0x19f   : > { %v808_v34 = vrot.slane %v2014_v32, %v807_v27  ;;  %v812_v35 = vrot.slane %v2019_v33, %v807_v27  ;;  %v834_v36 = vrot.slane %v2014_v32, %v833_v28  ;;  %v838_v37 = vrot.slane %v2019_v33, %v833_v28 }
 0x1a0   : > { %994 = vrot.lane.b32.xlu1 %v1970_v10, %s1761_s23  ;;  %v859_v41 = vrot.slane %v2014_v32, %v858_v30  ;;  %v863_v44 = vrot.slane %v2019_v33, %v858_v30  ;;  %v884_v56 = vrot.slane %v2014_v32, %v883_v45  ;;  %v888_v57 = vrot.slane %v2019_v33, %v883_v45  ;;  %s622_s23 = scalar_lea.vmem [#allocation2], %s1576_s26  ;;  %s1684_s26 = sshll.u32 %s1762_s2, 4  ;;  %s1685_s26 = int_to_ptr.vmem [resolvable:$false] %s1684_s26 }
 0x1a1   : > { %v902_v58 = vrot.slane %v2014_v32, %v901_v46  ;;  %v906_v59 = vrot.slane %v2019_v33, %v901_v46  ;;  %s1513_s3 = sshll.u32 %s622_s23, 4  ;;  %s1686_s5 = scalar_lea.vmem %s1685_s26, 256  ;;  %s2154_s3 = int_to_ptr.vmem [resolvable:$true] %s1513_s3 }
 0x1a2   : > { %s1680_s21 = scalar_lea.vmem %s2154_s3, 128  ;;  %p1687_p0 = scmp.lt.s32.totalorder %s2154_s3, %s1685_s26 }
 0x1a3   : > { %v908_v22 = vmul.f32 %v906_v59, %v1970_v10  ;;  %p1681_p11 = scmp.ne.s32.totalorder %s2154_s3, %s1680_s21  ;;  %p1688_p1 = scmp.lt.s32.totalorder %s1686_s5, %s1680_s21 }
 0x1a5   : > { %p1682_p12 = pnand %p1681_p11, %p1906_p5  ;;  %p1689_p2 = por %p1688_p1, %p1687_p0 }
 0x1a7   : > { %p1683_p13 = pneg %p1682_p12 }
 0x1a9   : > { %p1690_p3 = pnand %p1689_p2, %p1683_p13 }
 0x1ee   : > { %v850_v18 = vpop.permute.xlu0 %849  ;;  %v797_v19 = vpop.permute.xlu1 %796 }
 0x1f2   : > { %v1999_v20 = vpop.permute.xlu0 %942  ;;  %v825_v21 = vpop.permute.xlu1 %824 }
 0x1f6   : > { %v799_v23 = vpop.permute.xlu0 %798  ;;  %v875_v24 = vpop.permute.xlu1 %874 }
 0x1f7   : > { %v803_v42 = vsel %vm802_vm3, %v797_v19, %v799_v23  ;;  %v804_v43 = vsel %vm802_vm3, %v799_v23, %v797_v19 }
 0x1f8   : > { %v813_v50 = vmul.f32 %v808_v34, %v804_v43  ;;  %v814_v51 = vmul.f32 %v812_v35, %v803_v42 }
 0x1fa   : > { %v2007_v29 = vpop.permute.xlu1 %917  ;;  %v827_v31 = vpop.permute.xlu0 %826  ;;  %v820_v0 = vmul.f32 %v818_v5, %v813_v50  ;;  %v821_v2 = vmul.f32 %v818_v5, %v814_v51 }
 0x1fb   : > { %v829_v39 = vsel %vm828_vm2, %v825_v21, %v827_v31  ;;  %v830_v40 = vsel %vm828_vm2, %v827_v31, %v825_v21  ;;  %v907_v21 = vmul.f32 %v902_v58, %v1964_v7  ;;  %v976_v7 = vsub.s32 7, %v2001_v25 }
 0x1fc   : > { %v839_v47 = vmul.f32 %v834_v36, %v830_v40  ;;  %v840_v48 = vmul.f32 %v838_v37, %v829_v39  ;;  %v914_v40 = vmul.f32 %v1993_v15, %v908_v22 }
 0x1fd   : > { %v913_v39 = vmul.f32 %v1993_v15, %v907_v21  ;;  %v977_v45 = vrot.slane %v2014_v32, %v976_v7 }
 0x1fe   : > { %v2026_v38 = vpop.permute.xlu1 %967  ;;  %v845_v60 = vmul.f32 %v843_v1, %v839_v47  ;;  %v846_v61 = vmul.f32 %v843_v1, %v840_v48  ;;  %v926_v1 = vsub.s32 5, %v2001_v25 }
 0x200   : > { %v847_v23 = vadd.f32 %v845_v60, %v820_v0  ;;  %v848_v5 = vadd.f32 %v846_v61, %v821_v2  ;;  %v931_v37 = vrot.slane %v2019_v33, %v926_v1 }
 0x202   : > { %v852_v49 = vpop.permute.xlu1 %851 }
 0x203   : > { %v854_v52 = vsel %vm853_vm4, %v850_v18, %v852_v49  ;;  %v855_v53 = vsel %vm853_vm4, %v852_v49, %v850_v18 }
 0x204   : > { %v864_v54 = vmul.f32 %v859_v41, %v855_v53  ;;  %v865_v55 = vmul.f32 %v863_v44, %v854_v52  ;;  %v1582_v53 = vld [vmem:[%s2238_s0 + $0x10] ss:$0 sm:$0xff] }
 0x206   : > { %v877_v62 = vpop.permute.xlu1 %876  ;;  %v870_v9 = vmul.f32 %v868_v12, %v864_v54  ;;  %v871_v11 = vmul.f32 %v868_v12, %v865_v55  ;;  %v956_v12 = vrot.slane %v2019_v33, %v951_v63 }
 0x207   : > { %v879_v4 = vsel %vm878_vm5, %v875_v24, %v877_v62  ;;  %v880_v6 = vsel %vm878_vm5, %v877_v62, %v875_v24  ;;  %v952_v24 = vrot.slane %v2014_v32, %v951_v63 }
 0x208   : > { %v889_v18 = vmul.f32 %v884_v56, %v880_v6  ;;  %v890_v19 = vmul.f32 %v888_v57, %v879_v4  ;;  %v872_v34 = vadd.f32 %v870_v9, %v847_v23  ;;  %v873_v10 = vadd.f32 %v871_v11, %v848_v5 }
 0x20a   : > { %v895_v27 = vmul.f32 %v1989_v13, %v889_v18  ;;  %v896_v28 = vmul.f32 %v1989_v13, %v890_v19  ;;  %v945_v30 = vpop.permute.xlu1 %944  ;;  %v927_v13 = vrot.slane %v2014_v32, %v926_v1 }
 0x20b   : > { %v1011_v31 = vpop.permute.xlu0 %1010  ;;  %v947_v35 = vsel %vm946_vm6, %v1999_v20, %v945_v30  ;;  %v948_v36 = vsel %vm946_vm6, %v945_v30, %v1999_v20  ;;  %v981_v20 = vrot.slane %v2019_v33, %v976_v7 }
 0x20c   : > { %v897_v41 = vadd.f32 %v895_v27, %v872_v34  ;;  %v898_v25 = vadd.f32 %v896_v28, %v873_v10  ;;  %v957_v43 = vmul.f32 %v952_v24, %v947_v35  ;;  %v958_v44 = vmul.f32 %v956_v12, %v948_v36  ;;  %v1033_v24 = vld [vmem:[%s2202_s8] sm:$0xf] }
 0x20d   : > { %v1121_v10 = vld [vmem:[%s2203_s9] sm:$0xf] }
 0x20e   : > { %v970_v42 = vpop.permute.xlu1 %969  ;;  %v915_v32 = vadd.f32 %v913_v39, %v897_v41  ;;  %v916_v52 = vadd.f32 %v914_v40, %v898_v25  ;;  %v963_v26 = vmul.f32 %v1991_v14, %v957_v43  ;;  %v964_v58 = vmul.f32 %v1991_v14, %v958_v44  ;;  %v1217_v39 = vld [vmem:[%s2206_s12] sm:$0xf] }
 0x20f   : > { %v920_v46 = vpop.permute.xlu0 %919  ;;  %v972_v47 = vsel %vm971_vm7, %v2026_v38, %v970_v42  ;;  %v973_v48 = vsel %vm971_vm7, %v970_v42, %v2026_v38  ;;  %v1583_v38 = vld [vmem:[%s2238_s0 + $0x18] ss:$0 sm:$0xff]  ;;  %v1230_v40 = vld [vmem:[%s2207_s13] sm:$0xf] }
 0x210   : > { %v922_v49 = vsel %vm921_vm8, %v2007_v29, %v920_v46  ;;  %v923_v15 = vsel %vm921_vm8, %v920_v46, %v2007_v29  ;;  %v982_v54 = vmul.f32 %v977_v45, %v972_v47  ;;  %v983_v55 = vmul.f32 %v981_v20, %v973_v48  ;;  %v1231_v41 = vld [vmem:[%s2208_s14] sm:$0xf] }
 0x211   : > { %v932_v50 = vmul.f32 %v927_v13, %v922_v49  ;;  %v933_v51 = vmul.f32 %v931_v37, %v923_v15  ;;  %v1131_v37 = vld [vmem:[%s2205_s11] sm:$0xf] }
 0x212   : > { %v995_v33 = vpop.permute.xlu1 %994  ;;  %v988_v2 = vmul.f32 %v1995_v16, %v982_v54  ;;  %v989_v4 = vmul.f32 %v1995_v16, %v983_v55  ;;  %v1303_v25 = vld [vmem:[%s2210_s16] sm:$0xff] }
 0x213   : > { %v938_v56 = vmul.f32 %v1997_v17, %v932_v50  ;;  %v939_v29 = vmul.f32 %v1997_v17, %v933_v51  ;;  %v993_v57 = vpop.permute.xlu0 %992  ;;  %v1398_v42 = vld [vmem:[%s2212_s18] sm:$0xf] }
 0x214   : > { %v997_v59 = vsel %vm996_vm9, %v993_v57, %v995_v33  ;;  %v998_v60 = vsel %vm996_vm9, %v995_v33, %v993_v57  ;;  %v1484_v43 = vld [vmem:[%s2213_s19] sm:$0xf] }
 0x215   : > { %v940_v61 = vadd.f32 %v938_v56, %v915_v32  ;;  %v941_v62 = vadd.f32 %v939_v29, %v916_v52  ;;  %v1007_v63 = vmul.f32 %v1582_v53, %v997_v59  ;;  %v1008_v0 = vmul.f32 %v1583_v38, %v998_v60  ;;  %v1130_v46 = vld [vmem:[%s2204_s10] sm:$0xf] }
 0x217   : > { %v965_v6 = vadd.f32 %v963_v26, %v940_v61  ;;  %v966_v9 = vadd.f32 %v964_v58, %v941_v62  ;;  %v1013_v11 = vmul.f32 %v1011_v31, %v1007_v63  ;;  %v1014_v18 = vmul.f32 %v1011_v31, %v1008_v0  ;;  %v1021_v21 = vpop.permute.xlu0 %1020 }
 0x219   : > { %v990_v17 = vadd.f32 %v988_v2, %v965_v6  ;;  %v991_v19 = vadd.f32 %v989_v4, %v966_v9 }
 0x21b   : > { %v1015_v22 = vadd.f32 %v1013_v11, %v990_v17  ;;  %v1016_v1 = vadd.f32 %v1014_v18, %v991_v19 }
 0x21d   : > { %v1023_v14 = vadd.f32 %v1021_v21, %v1015_v22  ;;  %v1024_v23 = vadd.f32 %v1021_v21, %v1016_v1 }
 0x21f   : > { %v1027_v5 = vrot.slane %v1023_v14, 4  ;;  %v1028_v27 = vrot.slane %v1024_v23, 4 }
 0x221   : > { %v1031_v28 = vmul.f32 %v1027_v5, %v1023_v14  ;;  %v1032_v30 = vmul.f32 %v1028_v27, %v1024_v23 }
 0x223   : > { %1584 = vmatprep.subr.msk.mxu1 %vm634_vm0, %v1032_v30 }
 0x224   : > { %1585 = vmatpush1.msk.msra.mxu1 %vm634_vm0, %v1031_v28 }
 0x225   : > { %1586 = vmatmul.mubr.msk.f32.vlgmr.msra.gmra.mrb[0].mxu1 %vm710_vm1, %v1033_v24 }
 0x226   : > { %1382 = vmatprep.mubr.f32.mxu1 %v1745_v3 }
 0x2f8   : > { %v1109_v16 = vpop.f32.mrb[0].mxu1 }
 0x2f9   : > { %v1114_v12 = vsel %vm634_vm0, %v1109_v16, 0.0  ;;  %v1111_v31 = vpop.f32.mrb[1].mxu1 }
 0x2fa   : > { %v1115_v7 = vsel %vm634_vm0, %v1111_v31, 0.0 }
 0x2fb   : > { %v1116_v34 = vadd.f32 %v1115_v7, %v1114_v12 }
 0x2fd   : > { %1117 = vadd.xlane.f32.xlu1 %v1116_v34 }
 0x38a   : > { %v1118_v35 = vpop.xlane.xlu1 %1117 }
 0x38b   : > { %v1120_v36 = vmul.f32 0.00390625, %v1118_v35 }
 0x38d   : > { %v1122_v13 = vadd.f32 %v1121_v10, %v1120_v36 }
 0x38f   : > { %1125 = vperm.xlu0 %1670, %v1122_v13  }
 0x393   : > { %1134 = vperm.xlu0 %1670, %v1131_v37  }
 0x397   : > { %1220 = vperm.xlu0 %1670, %v1217_v39  }
 0x39b   : > { %1287 = vperm.xlu0 %1670, %v1230_v40  }
 0x39f   : > { %1297 = vperm.xlu0 %1670, %v1231_v41  }
 0x3a3   : > { %1306 = vperm.xlu0 %1670, %v1303_v25  }
 0x3a7   : > { %1401 = vperm.xlu0 %1670, %v1398_v42  }
 0x3ab   : > { %1487 = vperm.xlu0 %1670, %v1484_v43  }
 0x40e   : > { %v1126_v44 = vpop.permute.xlu0 %1125 }
 0x40f   : > { %v1128_v45 = vmul.f32 %v1126_v44, %v1031_v28  ;;  %v1129_v20 = vmul.f32 %v1126_v44, %v1032_v30  ;;  %v1302_v44 = vld [vmem:[%s2209_s15] sm:$0xff] }
 0x411   : > { %1587 = vmatprep.subr.msk.mxu0 %vm634_vm0, %v1129_v20 }
 0x412   : > { %1588 = vmatpush1.msk.msra.mxu0 %vm634_vm0, %v1128_v45  ;;  %v1135_v47 = vpop.permute.xlu0 %1134 }
 0x413   : > { %1589 = vmatmul.mubr.msk.f32.vlgmr.msra.gmra.mrb[2].mxu0 %vm710_vm1, %v1130_v46 }
 0x414   : > { %1477 = vmatprep.mubr.f32.mxu0 %v1745_v3 }
 0x416   : > { %v1221_v50 = vpop.permute.xlu0 %1220 }
 0x41a   : > { %v1288_v13 = vpop.permute.xlu0 %1287 }
 0x41e   : > { %v1298_v25 = vpop.permute.xlu0 %1297 }
 0x422   : > { %v1307_v45 = vpop.permute.xlu0 %1306 }
 0x4e6   : > { %v1212_v48 = vpop.f32.mrb[2].mxu0 }
 0x4e7   : > { %v1213_v49 = vadd.f32 %v1212_v48, %v1135_v47  ;;  %v1214_v15 = vpop.f32.mrb[3].mxu0 }
 0x4e8   : > { %v1215_v51 = vadd.f32 %v1214_v15, %v1135_v47 }
 0x4e9   : > { %v1223_v32 = vmul.f32 %v1221_v50, %v1213_v49 }
 0x4ea   : > { %v1224_v52 = vmul.f32 %v1221_v50, %v1215_v51 }
 0x4ec   : > { %v1227_v33 = vcombine.low %v1223_v32, %v1224_v52  ;;  %v1397_v32 = vld [vmem:[%s2211_s17] sm:$0xf]  ;;  %v1402_v52 = vpop.permute.xlu0 %1401 }
 0x4ee   : > { %v2124_v53 = vadd.f32 %v1227_v33, %v1942_v8 }
 0x4f0   : > { %v1233_v38 = vcombine.high %v2124_v53, %v2124_v53  ;;  %v1235_v54 = vsel %vm634_vm0, %v2124_v53, 0.0 }
 0x4f1   : > { %v1236_v55 = vrot.slane %v1235_v54, 4 }
 0x4f2   : > { %v1242_v3 = vsel %vm634_vm0, %v1233_v38, 0.0 }
 0x4f3   : > { %v1237_v56 = vadd.f32 %v1236_v55, %v1235_v54  ;;  %v1243_v29 = vrot.slane %v1242_v3, 4  ;;  %v1488_v55 = vpop.permute.xlu0 %1487 }
 0x4f5   : > { %v1238_v57 = vrot.slane %v1237_v56, 2  ;;  %v1244_v26 = vadd.f32 %v1243_v29, %v1242_v3 }
 0x4f7   : > { %v1239_v58 = vadd.f32 %v1238_v57, %v1237_v56  ;;  %v1245_v59 = vrot.slane %v1244_v26, 2 }
 0x4f9   : > { %v1240_v60 = vrot.slane %v1239_v58, 1  ;;  %v1246_v61 = vadd.f32 %v1245_v59, %v1244_v26 }
 0x4fb   : > { %v1241_v62 = vadd.f32 %v1240_v60, %v1239_v58  ;;  %v1247_v8 = vrot.slane %v1246_v61, 1 }
 0x4fd   : > { %v1248_v63 = vadd.f32 %v1247_v8, %v1246_v61  ;;  %v1249_v0 = vmul.f32 0.25, %v1241_v62 }
 0x4ff   : > { %v1250_v2 = vmul.f32 0.25, %v1248_v63 }
 0x501   : > { %v1253_v4 = vcombine.low %v1249_v0, %v1250_v2 }
 0x503   : > { %v1255_v6 = vsub.f32 %v2124_v53, %v1253_v4 }
 0x505   : > { %v1256_v9 = vmul.f32 %v1255_v6, %v1255_v6 }
 0x507   : > { %v1258_v11 = vcombine.high %v1256_v9, %v1256_v9  ;;  %v1260_v18 = vsel %vm634_vm0, %v1256_v9, 0.0 }
 0x508   : > { %v1261_v17 = vrot.slane %v1260_v18, 4 }
 0x509   : > { %v1267_v19 = vsel %vm634_vm0, %v1258_v11, 0.0 }
 0x50a   : > { %v1262_v21 = vadd.f32 %v1261_v17, %v1260_v18  ;;  %v1268_v22 = vrot.slane %v1267_v19, 4 }
 0x50c   : > { %v1263_v1 = vrot.slane %v1262_v21, 2  ;;  %v1269_v14 = vadd.f32 %v1268_v22, %v1267_v19 }
 0x50e   : > { %v1264_v23 = vadd.f32 %v1263_v1, %v1262_v21  ;;  %v1270_v5 = vrot.slane %v1269_v14, 2 }
 0x510   : > { %v1265_v27 = vrot.slane %v1264_v23, 1  ;;  %v1271_v28 = vadd.f32 %v1270_v5, %v1269_v14 }
 0x512   : > { %v1266_v30 = vadd.f32 %v1265_v27, %v1264_v23  ;;  %v1272_v24 = vrot.slane %v1271_v28, 1 }
 0x514   : > { %v1273_v16 = vadd.f32 %v1272_v24, %v1271_v28  ;;  %v1274_v12 = vmul.f32 0.25, %v1266_v30 }
 0x516   : > { %v1275_v31 = vmul.f32 0.25, %v1273_v16  ;;  %v1276_v7 = vadd.f32 1e-06, %v1274_v12 }
 0x518   : > { %v1277_v34 = vadd.f32 1e-06, %v1275_v31  ;;  %1676 = vrsqrt.f32 %v1276_v7 }
 0x51a   : > { %1678 = vrsqrt.f32 %v1277_v34 }
 0x522   : > { %v1677_v10 = vpop.eup %1676 }
 0x524   : > { %v1679_v35 = vpop.eup %1678 }
 0x525   : > { %v1282_v36 = vcombine.low %v1677_v10, %v1679_v35 }
 0x527   : > { %v1284_v37 = vmul.f32 %v1282_v36, %v1255_v6 }
 0x529   : > { %v1291_v39 = vcombine.high %v1284_v37, %v1284_v37  ;;  %v1293_v40 = vmul.f32 %v1288_v13, %v1284_v37 }
 0x52b   : > { %v1294_v41 = vmul.f32 %v1291_v39, %v1288_v13  ;;  %v1300_v43 = vadd.f32 %v1298_v25, %v1293_v40 }
 0x52d   : > { %v1301_v42 = vadd.f32 %v1298_v25, %v1294_v41 }
 0x52f   : > { %1590 = vmatprep.subr.msk.mxu1 %vm634_vm0, %v1301_v42 }
 0x530   : > { %1591 = vmatpush1.msk.msra.mxu1 %vm634_vm0, %v1300_v43 }
 0x531   : > { %1592 = vmatmul.mubr.msk.f32.vlgmr.msra.gmra.mrb[2].mxu1 %vm710_vm1, %v1302_v44 }
 0x604   : > { %v1384_v20 = vpop.f32.mrb[2].mxu1 }
 0x605   : > { %v1385_v46 = vadd.f32 %v1384_v20, %v1307_v45  ;;  %v1386_v47 = vpop.f32.mrb[3].mxu1 }
 0x606   : > { %v1387_v48 = vadd.f32 %v1386_v47, %v1307_v45 }
 0x607   : > { %v1391_v49 = vrot.slane %v1385_v46, 4 }
 0x608   : > { %v1392_v15 = vrot.slane %v1387_v48, 4 }
 0x609   : > { %v1395_v51 = vmul.f32 %v1391_v49, %v1385_v46 }
 0x60a   : > { %v1396_v50 = vmul.f32 %v1392_v15, %v1387_v48 }
 0x60c   : > { %1593 = vmatprep.subr.msk.mxu0 %vm634_vm0, %v1396_v50 }
 0x60d   : > { %1594 = vmatpush1.msk.msra.mxu0 %vm634_vm0, %v1395_v51 }
 0x60e   : > { %1595 = vmatmul.mubr.msk.f32.vlgmr.msra.gmra.mrb[4].mxu0 %vm710_vm1, %v1397_v32 }
 0x6e1   : > { %v1479_v33 = vpop.f32.mrb[4].mxu0 }
 0x6e2   : > { %v1480_v38 = vadd.f32 %v1479_v33, %v1402_v52  ;;  %v1481_v54 = vpop.f32.mrb[5].mxu0 }
 0x6e3   : > { %v1482_v3 = vadd.f32 %v1481_v54, %v1402_v52 }
 0x6e4   : > { %v1490_v56 = vmul.f32 %v1488_v55, %v1480_v38 }
 0x6e5   : > { %v1491_v29 = vmul.f32 %v1488_v55, %v1482_v3 }
 0x6e7   : > { %v1494_v57 = vcombine.low %v1490_v56, %v1491_v29 }
 0x6e9   : > { %v1496_v26 = vadd.f32 %v1494_v57, %v2124_v53 }
 0x6eb   : > { %1497 = vst [vmem:[%s622_s23] sm:$0xff] %v1496_v26 }
 0x6ec   : > { %1693 = shalt.err (!%p1690_p3)
}
 0x6ed   : > { %s1694_s25 = scalar_lea.hbm %s2152_s29, 128  ;;  %s1698_s28 = scalar_lea.hbm %s2214_s20, 256 }
 0x6ee   : > { %p1695_p4 = scmp.ne.s32.totalorder %s2152_s29, %s1694_s25  ;;  %p1699_p9 = scmp.lt.u32.totalorder %s2152_s29, %s2214_s20 }
 0x6ef   : > { %p1700_p10 = scmp.lt.u32.totalorder %s1698_s28, %s1694_s25  ;;  %p1702_p12 = scmp.lt.u32.totalorder %s1694_s25, %s2152_s29 }
 0x6f0   : > { %p1696_p7 = pnand %p1695_p4, %p1906_p5 }
 0x6f1   : > { %p1701_p11 = por %p1700_p10, %p1699_p9 }
 0x6f2   : > { %p1697_p8 = pneg %p1696_p7 }
 0x6f3   : > { %p1703_p13 = por %p1702_p12, %p1701_p11 }
 0x6f5   : > { %p1704_p0 = pnand %p1703_p13, %p1697_p8 }
 0x6f7   : > { %1707 = shalt.err (!%p1704_p0)
}
 0x6f8   : > { %1603 = dma.vmem_to_hbm [thread:$0]  (%p1906_p5), %s2154_s3, 128, %s2152_s29, %s1499_s30  }
 0x6f9 PF: > { %p1609_p1 = scmp.ge.s32.totalorder %s1742_s24, 2  ;;  %s1525_s21 = sand.u32 1, %s1730_s1  }
 0x6fa   : > { %s1526_s26 = scalar_lea.sflag [#allocation3], %s1525_s21 }
 0x6fb   : > { %p1606_p2 = pnand %p1609_p1, %p1910_p6 }
 0x6fd   : > { %1725 = dma.done.wait (!%p1606_p2), %s1526_s26, 128  }
 0x6fe   : > { %1727 = vsyncadd (!%p1606_p2), %s1526_s26, 4294967168  ;;  %s2240_s24 = sld [smem:[#allocation6_spill]]  ;;  %s2241_s25 = sld [smem:[#allocation5_spill]] }
 0x6ff   : > { %s2242_s23 = sld [smem:[#allocation7_spill]]  ;;  %s2243_s1 = smov %s1734_s22 }
 0x704   : > { %p30_p3 = scmp.ge.s32.totalorder %s2240_s24, 4   ;;  %s2244_s22 = smov %s2241_s25 }
 0x706   :  { %32 = sbr.rel (!%p30_p3) target bundleno = 10 (0xa), region = 135 }
 0x70d   :  { %1531 = vsyncpa [#allocation3], 1 }
 0x70e   :  { %1533 = vsyncpa [#allocation3 + $0x1], 1 }

</bundles_post_ra>
